<compile_context>
chip_gen: v7x
topology: tpu7x:2x2x1
jax: 0.10.0
libtpu: 0.0.40
codegen_flags: <defaults>
</compile_context>

<pallas_src>
import jax
import jax.numpy as jnp
from jax.experimental import pallas as pl
from jax.experimental.pallas import tpu as pltpu


# Valid TPU vreg float dtypes -> minimum sublane tile (second-minor dim).
_SUBLANE = {
    jnp.dtype(jnp.float32): 8,
    jnp.dtype(jnp.bfloat16): 16,
    jnp.dtype(jnp.float16): 16,
}


def _sigmoid_double_kernel(x_ref, o_ref):
    x = x_ref[...]
    # sigmoid(x + x) == 0.5 * tanh(x) + 0.5 (exact identity):
    # one EUP transcendental + one VALU fma per element.
    half = jnp.asarray(0.5, dtype=x.dtype)
    o_ref[...] = half * jnp.tanh(x) + half


def _target_block_bytes() -> int:
    """Generation-aware block size for an HBM-streaming elementwise kernel."""
    try:
        vmem = getattr(pltpu.get_tpu_info(), "vmem_capacity_bytes", 128 << 20)
    except Exception:
        vmem = 128 << 20
    if vmem < (128 << 20):
        # v7x: 64 MiB VMEM per TC but 3.2 TB/s HBM -> bigger blocks (4 MiB;
        # 16 MiB resident with in+out double buffering) keep the ~0.35 us
        # per-grid-step overhead under ~10% of the DMA time.
        return 4 << 20
    # v5e/v6e (128 MiB VMEM): 2 MiB blocks are already ~95% of the HBM
    # roofline on v5e and comfortably inside the default scoped VMEM.
    return 2 << 20


def simple_sigmoid_model(x: jax.Array) -> jax.Array:
    """Forward of SimpleSigmoidModel: (x + x).sigmoid()."""
    orig_shape = x.shape

    # torch.sigmoid promotes integer inputs to float; TPU vregs only hold
    # <=32-bit floats, so compute anything non-(f32/bf16/f16) in float32.
    if jnp.dtype(x.dtype) not in _SUBLANE:
        x = x.astype(jnp.float32)
    dtype = x.dtype
    itemsize = jnp.dtype(dtype).itemsize
    min_rows = _SUBLANE[jnp.dtype(dtype)]

    total = x.size
    if total == 0:
        return jnp.zeros(orig_shape, dtype)

    # Lane-dense 2D view: widest last dim (multiple of 128) that exactly
    # divides the element count, so the common case needs no pad / no slice.
    lane = 128
    if total % 128 == 0:
        for cand in (2048, 1024, 512, 256, 128):
            if total % cand == 0:
                lane = cand
                break

    rows = pl.cdiv(total, lane)
    padded_total = rows * lane

    flat = x.reshape(-1)
    if padded_total != total:
        # Ragged-size fallback: pad by < lane (=128) elements only.
        flat = jnp.pad(flat, (0, padded_total - total))
    x2d = flat.reshape(rows, lane)

    # Block rows: whole array if it fits in one block (full-dim block is always
    # layout-legal), otherwise the largest sublane-aligned row count under the
    # generation-aware budget. Trailing partial block is masked by Pallas.
    block_bytes = _target_block_bytes()
    row_bytes = lane * itemsize
    if rows * row_bytes <= block_bytes:
        rt = rows
    else:
        rt = max(min_rows, (block_bytes // row_bytes) // min_rows * min_rows)
    grid = (pl.cdiv(rows, rt),)

    out2d = pl.pallas_call(
        _sigmoid_double_kernel,
        out_shape=jax.ShapeDtypeStruct((rows, lane), dtype),
        grid_spec=pltpu.PrefetchScalarGridSpec(
            num_scalar_prefetch=0,
            grid=grid,
            in_specs=[pl.BlockSpec((rt, lane), lambda i: (i, 0))],
            out_specs=pl.BlockSpec((rt, lane), lambda i: (i, 0)),
        ),
        compiler_params=pltpu.CompilerParams(
            # TODO(synk): on v7x, benchmark pltpu.CORE_PARALLEL (or pl.core_map
            # over a tensorcore mesh) to shard the grid over both TensorCores;
            # plain "parallel" is kept here since it compiles cleanly on every
            # generation and is a no-op-or-better elsewhere.
            dimension_semantics=("parallel",),
            # in+out double-buffered blocks (4x block) plus headroom.
            vmem_limit_bytes=4 * block_bytes + (8 << 20),
        ),
        cost_estimate=pl.CostEstimate(
            flops=2 * total,
            transcendentals=total,
            bytes_accessed=2 * total * itemsize,
        ),
    )(x2d)

    out_flat = out2d.reshape(-1)
    if padded_total != total:
        out_flat = out_flat[:total]
    return out_flat.reshape(orig_shape)


if __name__ == "__main__":
    key = jax.random.PRNGKey(0)
    # small NCHW-like input consistent with the elementwise forward
    x = jax.random.normal(key, (2, 4, 16, 16), dtype=jnp.float32)

    out = jax.block_until_ready(simple_sigmoid_model(x))

    ref = jax.nn.sigmoid(x + x)
    assert out.shape == x.shape and out.dtype == x.dtype
    assert jnp.allclose(out, ref, atol=1e-6, rtol=1e-6)
    print("KERNEL_OK")
</pallas_src>

<mosaic_0001>
module attributes {stable_mosaic.version = 11 : i64} {
  func.func @_sigmoid_double_kernel(%arg0: i32, %arg1: memref<1x2048xf32, #tpu.memory_space<vmem>>, %arg2: memref<1x2048xf32, #tpu.memory_space<vmem>>) attributes {dimension_semantics = [#tpu.dimension_semantics<parallel>], iteration_bounds = array<i64: 1>, scalar_prefetch = 0 : i64, scratch_operands = 0 : i64, tpu.core_type = #tpu.core_type<tc>, window_params = [{transform_indices = @transform_0, window_bounds = array<i64: 1, 2048>}, {transform_indices = @transform_1, window_bounds = array<i64: 1, 2048>}]} {
    %c0 = arith.constant 0 : index
    %c0_0 = arith.constant 0 : index
    %0 = vector.load %arg1[%c0, %c0_0] : memref<1x2048xf32, #tpu.memory_space<vmem>>, vector<1x2048xf32>
    %1 = math.tanh %0 : vector<1x2048xf32>
    %cst = arith.constant 5.000000e-01 : f32
    %2 = vector.broadcast %cst : f32 to vector<1x2048xf32>
    %3 = arith.mulf %2, %1 : vector<1x2048xf32>
    %cst_1 = arith.constant 5.000000e-01 : f32
    %4 = vector.broadcast %cst_1 : f32 to vector<1x2048xf32>
    %5 = arith.addf %3, %4 : vector<1x2048xf32>
    %c0_2 = arith.constant 0 : index
    %c0_3 = arith.constant 0 : index
    %6 = vector.load %arg2[%c0_2, %c0_3] : memref<1x2048xf32, #tpu.memory_space<vmem>>, vector<1x2048xf32>
    tpu.vector_store %arg2[%c0_2, %c0_3], %5 {strides = array<i32>} : memref<1x2048xf32, #tpu.memory_space<vmem>>, vector<1x2048xf32>,
    return
  }
  func.func @transform_0(%arg0: i32) -> (i32, i32) {
    %c0_i32 = arith.constant 0 : i32
    %c0_i32_0 = arith.constant 0 : i32
    return %arg0, %c0_i32 : i32, i32
  }
  func.func @transform_1(%arg0: i32) -> (i32, i32) {
    %c0_i32 = arith.constant 0 : i32
    %c0_i32_0 = arith.constant 0 : i32
    return %arg0, %c0_i32 : i32, i32
  }
}

</mosaic_0001>

<bundles_post_ra>
// kernel: tpu_custom_call.1
= control target key start
LH: loop header
LB: loop body
LE: loop exit
PB: predicated region body
PF: predicated region fallthrough
CT: control target
= control target key end

     0   :  { %6 = vsyncpa [#allocation3], 0  ;;  %s136_s0 = inlined_call_operand.hbm [shape: f32[1,2048], index: 0, kind: input, shape index: {}]   ;;  %s137_s1 = inlined_call_operand.hbm [shape: f32[1,2048], index: 1, kind: output, shape index: {}]  }
   0x1   :  { %7 = vsyncpa [#allocation4], 0  ;;  %s100_s6 = smov [#allocation2]   ;;  %s52_s10 = scalar_lea.hbm %s136_s0, 256 }
   0x2   :  { %s14_s7 = sshll.u32 %s100_s6, 4  ;;  %p53_p0 = scmp.ne.s32.totalorder %s136_s0, %s52_s10  ;;  %s15_s7 = int_to_ptr.vmem [resolvable:$true] %s14_s7 }
   0x3   :  { %p56_p1 = scmp.lt.u32.totalorder %s52_s10, %s136_s0 }
   0x5   :  { %p58_p2 = pnand %p56_p1, %p53_p0 }
   0x7   :  { %61 = shalt.err (!%p58_p2)
}
   0x8   :  { %s62_s15 = scalar_lea.vmem %s15_s7, 256  ;;  %p67_p4 = scmp.lt.s32.totalorder %s15_s7, %s15_s7 }
   0x9   :  { %p63_p3 = scmp.ne.s32.totalorder %s15_s7, %s62_s15  ;;  %p68_p5 = scmp.lt.s32.totalorder %s62_s15, %s62_s15 }
   0xb   :  { %p69_p6 = por %p68_p5, %p67_p4 }
   0xd   :  { %p70_p7 = pnand %p69_p6, %p63_p3 }
   0xf   :  { %73 = shalt.err (!%p70_p7)
}
  0x10   :  { %17 = dma.hbm_to_vmem [thread:$0]  %s136_s0, 256, %s15_s7, [#allocation3]  }
  0x11   :  { %96 = dma.done.wait [#allocation3], 256  }
  0x12   :  { %97 = vsyncadd [#allocation3], 4294967040  ;;  %v21_v0 = vld [vmem:[#allocation2] sm:$0xff]  ;;  %v22_v1 = vld [vmem:[#allocation2 + $0x8] sm:$0xff]  ;;  %s101_s18 = smov [#allocation5]  }
  0x13   :  { %48 = vtanh.f32 %v21_v0  ;;  %s37_s19 = sshll.u32 %s101_s18, 4  ;;  %s38_s19 = int_to_ptr.vmem [resolvable:$true] %s37_s19 }
  0x14   :  { %50 = vtanh.f32 %v22_v1  ;;  %s74_s20 = scalar_lea.vmem %s38_s19, 256  ;;  %p79_p9 = scmp.lt.s32.totalorder %s38_s19, %s38_s19 }
  0x15   :  { %p75_p8 = scmp.ne.s32.totalorder %s38_s19, %s74_s20  ;;  %p80_p10 = scmp.lt.s32.totalorder %s74_s20, %s74_s20 }
  0x17   :  { %p81_p11 = por %p80_p10, %p79_p9 }
  0x19   :  { %p82_p12 = pnand %p81_p11, %p75_p8 }
  0x1d   :  { %v49_v2 = vpop.eup %48 }
  0x1e   :  { %v51_v3 = vpop.eup %50  ;;  %v25_v4 = vmul.f32 0.5, %v49_v2 }
  0x1f   :  { %v26_v5 = vmul.f32 0.5, %v51_v3 }
  0x20   :  { %v27_v6 = vadd.f32 0.5, %v25_v4 }
  0x21   :  { %v28_v7 = vadd.f32 0.5, %v26_v5 }
  0x22   :  { %29 = vst [vmem:[#allocation5] sm:$0xff] %v27_v6 }
  0x23   :  { %30 = vst [vmem:[#allocation5 + $0x8] sm:$0xff] %v28_v7 }
  0x24   :  { %85 = shalt.err (!%p82_p12)
}
  0x25   :  { %s86_s22 = scalar_lea.hbm %s137_s1, 256 }
  0x26   :  { %p87_p13 = scmp.ne.s32.totalorder %s137_s1, %s86_s22  ;;  %p90_p0 = scmp.lt.u32.totalorder %s86_s22, %s137_s1 }
  0x28   :  { %p92_p1 = pnand %p90_p0, %p87_p13 }
  0x2a   :  { %95 = shalt.err (!%p92_p1)
}
  0x2b   :  { %40 = dma.vmem_to_hbm [thread:$0]  %s38_s19, 256, %s137_s1, [#allocation4]  }
  0x2c   :  { %98 = dma.done.wait [#allocation4], 256  }
  0x2d   :  { %99 = vsyncadd [#allocation4], 4294967040 }
  0x2e   :  { %44 = vsyncpa [#allocation3], 1 }
  0x2f   :  { %45 = vsyncpa [#allocation4], 1 }

</bundles_post_ra>
